<compile_context>
chip_gen: v6e
topology: v6e:2x2x1
jax: 0.10.0
libtpu: 0.0.40
codegen_flags: <defaults>
</compile_context>

<pallas_src>
import functools

import jax
import jax.numpy as jnp
from jax import lax
from jax.experimental import pallas as pl
from jax.experimental.pallas import tpu as pltpu


_VMEM_LIMIT_BYTES = 32 * 1024 * 1024      # explicit scoped-VMEM limit
_LOGITS_BUF_BUDGET = 8 * 1024 * 1024      # per-buffer logits tile budget


def _round_up(x, m):
    return ((x + m - 1) // m) * m


# ---------------------------------------------------------------------------
# Kernel 1: streaming cross-entropy partial sums over row-blocks of logits.
# ---------------------------------------------------------------------------
def _ce_partial_kernel(
    logits_ref,    # [TB, C]  caller dtype (cast to f32 in-kernel)
    targets_ref,   # [TB, 1]  int32
    part_ref,      # [1, 8, 128] f32 out: this block's CE partial sum (broadcast)
    *,
    inv_temperature,
    n_batch,       # true (un-padded) B
    block_b,
):
    i = pl.program_id(0)

    x = logits_ref[...].astype(jnp.float32) * inv_temperature        # (TB, C)

    # Row validity for the ragged last block (OOB HBM reads are garbage).
    row = lax.broadcasted_iota(jnp.int32, (block_b, 1), 0) + i * block_b
    valid = row < n_batch                                            # (TB, 1)

    # Row-wise logsumexp; mask invalid rows with a select (never a multiply).
    m = jnp.max(x, axis=-1, keepdims=True)                           # (TB, 1)
    lse = jnp.log(jnp.sum(jnp.exp(x - m), axis=-1, keepdims=True)) + m
    lse_sum = jnp.sum(jnp.where(valid, lse, 0.0))                    # scalar

    # Target-logit term: single 2-D masked reduction (row mask folded in).
    col = lax.broadcasted_iota(jnp.int32, x.shape, 1)                # (TB, C)
    tgt_mask = (col == targets_ref[...]) & valid                     # (TB, C)
    tgt_sum = jnp.sum(jnp.where(tgt_mask, x, 0.0))                   # scalar

    partial = lse_sum - tgt_sum
    part_ref[...] = jnp.broadcast_to(partial, part_ref.shape).astype(jnp.float32)


# ---------------------------------------------------------------------------
# Kernel 2: energy hinge losses (tiny, single-shot, exact-shape blocks).
# ---------------------------------------------------------------------------
def _energy_kernel(
    ek_ref,        # [1, Nk]  caller dtype
    eu_ref,        # [1, Nu]  caller dtype
    lk_ref,        # [1, 1] f32 out
    lu_ref,        # [1, 1] f32 out
    *,
    inv_mid_known,
    inv_mid_unknown,
    inv_n_known,
    inv_n_unknown,
):
    ek = ek_ref[...].astype(jnp.float32)
    hk = jnp.maximum(1.0 - ek * inv_mid_known, 0.0)
    lk_ref[0, 0] = jnp.sum(hk * hk) * inv_n_known

    eu = eu_ref[...].astype(jnp.float32)
    hu = jnp.maximum(eu * inv_mid_unknown - 1.0, 0.0)
    lu_ref[0, 0] = jnp.sum(hu * hu) * inv_n_unknown


# ---------------------------------------------------------------------------
# Wrapper (matches FinetuneLoss.forward semantics).
# ---------------------------------------------------------------------------
def finetune_loss(
    logits,            # net_out['normweight_fea2cen'], shape [B, C]
    targets,           # int targets, shape [B]
    energy_known,      # net_out['energy'], shape [Nk]
    energy_unknown,    # net_out_unknown['energy'], shape [Nu]
    *,
    mid_known,
    mid_unknown,
    gamma=1.0,
    temperature=1.0,
    block_b=None,      # optional override of the B-tile size
):
    B, C = logits.shape
    nk = int(energy_known.shape[0])
    nu = int(energy_unknown.shape[0])
    assert nk > 0 and nu > 0, "empty known/unknown batch (division by zero)"

    itemsize = jnp.dtype(logits.dtype).itemsize

    # --- B-tile: as big as an ~8 MiB/buffer budget allows (no artificial cap).
    if block_b is None:
        tb = _LOGITS_BUF_BUDGET // max(1, C * itemsize)
    else:
        tb = int(block_b)
    tb = min(tb, _round_up(B, 8))
    tb = max(8, (tb // 8) * 8)

    # Double-buffered logits must fit the scoped VMEM limit (leave headroom).
    # TODO(synk): add a C-tiled online-logsumexp variant for vocab-scale C.
    assert 2 * tb * C * itemsize + (1 << 20) <= _VMEM_LIMIT_BYTES, (
        f"logits block (tb={tb}, C={C}) too large for VMEM; "
        "needs a C-tiled online logsumexp")

    grid_b = pl.cdiv(B, tb)                   # ragged last block, no jnp.pad
    tgt2d = targets.astype(jnp.int32).reshape(B, 1)

    ce_kernel = functools.partial(
        _ce_partial_kernel,
        inv_temperature=1.0 / float(temperature),
        n_batch=B,
        block_b=tb,
    )

    partials = pl.pallas_call(
        ce_kernel,
        out_shape=jax.ShapeDtypeStruct((grid_b, 8, 128), jnp.float32),
        grid=(grid_b,),
        in_specs=[
            pl.BlockSpec((tb, C), lambda i: (i, 0)),
            pl.BlockSpec((tb, 1), lambda i: (i, 0)),
        ],
        # Each grid step owns its own lane-dense output block -> the batch
        # axis is truly parallel (megacore-safe on v7x).
        out_specs=pl.BlockSpec((1, 8, 128), lambda i: (i, 0, 0)),
        compiler_params=pltpu.CompilerParams(
            dimension_semantics=("parallel",),
            vmem_limit_bytes=_VMEM_LIMIT_BYTES,
        ),
    )(logits, tgt2d)

    loss_classification = jnp.sum(partials[:, 0, 0]) * (1.0 / B)

    # --- energy hinge losses: tiny single-shot kernel, exact-shape blocks ----
    ek2d = energy_known.reshape(1, nk)
    eu2d = energy_unknown.reshape(1, nu)
    energy_kernel = functools.partial(
        _energy_kernel,
        inv_mid_known=1.0 / float(mid_known),
        inv_mid_unknown=1.0 / float(mid_unknown),
        inv_n_known=1.0 / nk,
        inv_n_unknown=1.0 / nu,
    )
    scalar_spec = pl.BlockSpec((1, 1), lambda i: (0, 0))
    lk, lu = pl.pallas_call(
        energy_kernel,
        out_shape=(
            jax.ShapeDtypeStruct((1, 1), jnp.float32),
            jax.ShapeDtypeStruct((1, 1), jnp.float32),
        ),
        grid=(1,),
        in_specs=[
            pl.BlockSpec((1, nk), lambda i: (0, 0)),
            pl.BlockSpec((1, nu), lambda i: (0, 0)),
        ],
        out_specs=(scalar_spec, scalar_spec),
    )(ek2d, eu2d)

    loss_energy_known = lk[0, 0]
    loss_energy_unknown = lu[0, 0]
    loss_energy = gamma * (loss_energy_known + loss_energy_unknown)
    total = loss_classification + loss_energy
    # TODO(synk): nn.CrossEntropyLoss extras (ignore_index, class weights) are
    # not replicated — only the default mean-reduction behavior is implemented.
    return {
        "total": total,
        "loss_classification": loss_classification,
        "loss_energy": loss_energy,
        "loss_energy_known": loss_energy_known,
        "loss_energy_unknown": loss_energy_unknown,
    }


# ---------------------------------------------------------------------------
# Plain-JAX reference + check.
# ---------------------------------------------------------------------------
def _reference(logits, targets, ek, eu, mid_known, mid_unknown, gamma, temperature):
    x = logits.astype(jnp.float32) / temperature
    lse = jax.scipy.special.logsumexp(x, axis=-1)
    tgt = jnp.take_along_axis(x, targets[:, None].astype(jnp.int32), axis=-1)[:, 0]
    loss_cls = jnp.mean(lse - tgt)
    lk = jnp.sum(jnp.maximum(1.0 - ek / mid_known, 0.0) ** 2) / ek.shape[0]
    lu = jnp.sum(jnp.maximum(eu / mid_unknown - 1.0, 0.0) ** 2) / eu.shape[0]
    le = gamma * (lk + lu)
    return {
        "total": loss_cls + le,
        "loss_classification": loss_cls,
        "loss_energy": le,
        "loss_energy_known": lk,
        "loss_energy_unknown": lu,
    }


def _check(out, ref):
    for k in ("total", "loss_classification", "loss_energy",
              "loss_energy_known", "loss_energy_unknown"):
        assert jnp.allclose(out[k], ref[k], rtol=1e-5, atol=1e-5), (k, out[k], ref[k])


if __name__ == "__main__":
    key = jax.random.PRNGKey(0)
    k1, k2, k3, k4 = jax.random.split(key, 4)

    # small shapes; B, C, Nu deliberately not multiples of 8/128 to exercise
    # the ragged-last-block masking path
    B, C = 10, 40
    Bu = 7
    mid_known = 2.0
    mid_unknown = 1.0
    gamma = 0.5
    temperature = 2.0

    logits = jax.random.normal(k1, (B, C), dtype=jnp.float32)
    targets = jax.random.randint(k2, (B,), 0, C, dtype=jnp.int32)
    energy_known = jax.random.normal(k3, (B,), dtype=jnp.float32) * 2.0
    energy_unknown = jax.random.normal(k4, (Bu,), dtype=jnp.float32) * 2.0

    ref = _reference(logits, targets, energy_known, energy_unknown,
                     mid_known, mid_unknown, gamma, temperature)

    # single-block path (tb = 16 > B -> ragged block masking inside one block)
    out1 = finetune_loss(
        logits, targets, energy_known, energy_unknown,
        mid_known=mid_known, mid_unknown=mid_unknown,
        gamma=gamma, temperature=temperature,
    )
    jax.block_until_ready(out1)
    _check(out1, ref)

    # multi-block gridded path (2 row-blocks, ragged last block, parallel axis)
    out2 = finetune_loss(
        logits, targets, energy_known, energy_unknown,
        mid_known=mid_known, mid_unknown=mid_unknown,
        gamma=gamma, temperature=temperature, block_b=8,
    )
    jax.block_until_ready(out2)
    _check(out2, ref)

    print("KERNEL_OK")
</pallas_src>

<mosaic_0001>
module attributes {stable_mosaic.version = 11 : i64} {
  func.func @_ce_partial_kernel(%arg0: i32, %arg1: memref<16x40xf32, #tpu.memory_space<vmem>>, %arg2: memref<16x1xi32, #tpu.memory_space<vmem>>, %arg3: memref<1x8x128xf32, #tpu.memory_space<vmem>>) attributes {dimension_semantics = [#tpu.dimension_semantics<parallel>], iteration_bounds = array<i64: 1>, scalar_prefetch = 0 : i64, scratch_operands = 0 : i64, tpu.core_type = #tpu.core_type<tc>, window_params = [{transform_indices = @transform_0, window_bounds = array<i64: 16, 40>}, {transform_indices = @transform_1, window_bounds = array<i64: 16, 1>}, {transform_indices = @transform_2, window_bounds = array<i64: 1, 8, 128>}]} {
    %c0 = arith.constant 0 : index
    %c0_0 = arith.constant 0 : index
    %0 = vector.load %arg1[%c0, %c0_0] : memref<16x40xf32, #tpu.memory_space<vmem>>, vector<16x40xf32>
    %cst = arith.constant 5.000000e-01 : f32
    %1 = vector.broadcast %cst : f32 to vector<16x40xf32>
    %2 = arith.mulf %0, %1 : vector<16x40xf32>
    %3 = tpu.iota {dimensions = array<i32: 0>} : vector<16x1xi32>
    %c16_i32 = arith.constant 16 : i32
    %4 = arith.muli %arg0, %c16_i32 : i32
    %5 = vector.broadcast %4 : i32 to vector<16x1xi32>
    %6 = arith.addi %3, %5 : vector<16x1xi32>
    %c10_i32 = arith.constant 10 : i32
    %7 = vector.broadcast %c10_i32 : i32 to vector<16x1xi32>
    %8 = arith.cmpi slt, %6, %7 : vector<16x1xi32>
    %cst_1 = arith.constant dense<0xFF800000> : vector<16xf32>
    %9 = vector.multi_reduction <maximumf>, %2, %cst_1 [1] : vector<16x40xf32> to vector<16xf32>
    %10 = vector.shape_cast %9 : vector<16xf32> to vector<16x1xf32>
    %11 = vector.broadcast %10 : vector<16x1xf32> to vector<16x40xf32>
    %12 = arith.subf %2, %11 : vector<16x40xf32>
    %13 = math.exp %12 : vector<16x40xf32>
    %cst_2 = arith.constant dense<0.000000e+00> : vector<16xf32>
    %14 = vector.multi_reduction <add>, %13, %cst_2 [1] : vector<16x40xf32> to vector<16xf32>
    %15 = vector.shape_cast %14 : vector<16xf32> to vector<16x1xf32>
    %16 = math.log %15 : vector<16x1xf32>
    %17 = arith.addf %16, %10 : vector<16x1xf32>
    %cst_3 = arith.constant 0.000000e+00 : f32
    %18 = vector.broadcast %cst_3 : f32 to vector<16x1xf32>
    %19 = arith.select %8, %17, %18 : vector<16x1xi1>, vector<16x1xf32>
    %20 = vector.shape_cast %19 : vector<16x1xf32> to vector<1x16x1xf32>
    %cst_4 = arith.constant dense<0.000000e+00> : vector<1xf32>
    %21 = vector.multi_reduction <add>, %20, %cst_4 [1, 2] : vector<1x16x1xf32> to vector<1xf32>
    %22 = vector.shape_cast %21 : vector<1xf32> to vector<1x1x1xf32>
    %23 = vector.extract %22[0, 0, 0] : f32 from vector<1x1x1xf32>
    %24 = tpu.iota {dimensions = array<i32: 1>} : vector<16x40xi32>
    %c0_5 = arith.constant 0 : index
    %c0_6 = arith.constant 0 : index
    %25 = vector.load %arg2[%c0_5, %c0_6] : memref<16x1xi32, #tpu.memory_space<vmem>>, vector<16x1xi32>
    %26 = vector.broadcast %25 : vector<16x1xi32> to vector<16x40xi32>
    %27 = arith.cmpi eq, %24, %26 : vector<16x40xi32>
    %28 = vector.broadcast %8 : vector<16x1xi1> to vector<16x40xi1>
    %29 = arith.andi %27, %28 : vector<16x40xi1>
    %cst_7 = arith.constant 0.000000e+00 : f32
    %30 = vector.broadcast %cst_7 : f32 to vector<16x40xf32>
    %31 = arith.select %29, %2, %30 : vector<16x40xi1>, vector<16x40xf32>
    %32 = vector.shape_cast %31 : vector<16x40xf32> to vector<1x16x40xf32>
    %cst_8 = arith.constant dense<0.000000e+00> : vector<1xf32>
    %33 = vector.multi_reduction <add>, %32, %cst_8 [1, 2] : vector<1x16x40xf32> to vector<1xf32>
    %34 = vector.shape_cast %33 : vector<1xf32> to vector<1x1x1xf32>
    %35 = vector.extract %34[0, 0, 0] : f32 from vector<1x1x1xf32>
    %36 = arith.subf %23, %35 : f32
    %37 = vector.broadcast %36 : f32 to vector<1x8x128xf32>
    %c0_9 = arith.constant 0 : index
    %c0_10 = arith.constant 0 : index
    %c0_11 = arith.constant 0 : index
    %38 = vector.load %arg3[%c0_9, %c0_10, %c0_11] : memref<1x8x128xf32, #tpu.memory_space<vmem>>, vector<1x8x128xf32>
    tpu.vector_store %arg3[%c0_9, %c0_10, %c0_11], %37 {strides = array<i32>} : memref<1x8x128xf32, #tpu.memory_space<vmem>>, vector<1x8x128xf32>,
    return
  }
  func.func @transform_0(%arg0: i32) -> (i32, i32) {
    %c0_i32 = arith.constant 0 : i32
    %c0_i32_0 = arith.constant 0 : i32
    return %arg0, %c0_i32 : i32, i32
  }
  func.func @transform_1(%arg0: i32) -> (i32, i32) {
    %c0_i32 = arith.constant 0 : i32
    %c0_i32_0 = arith.constant 0 : i32
    return %arg0, %c0_i32 : i32, i32
  }
  func.func @transform_2(%arg0: i32) -> (i32, i32, i32) {
    %c0_i32 = arith.constant 0 : i32
    %c0_i32_0 = arith.constant 0 : i32
    %c0_i32_1 = arith.constant 0 : i32
    return %arg0, %c0_i32, %c0_i32_0 : i32, i32, i32
  }
}

</mosaic_0001>

<bundles_post_ra>
// kernel: tpu_custom_call.1
= control target key start
LH: loop header
LB: loop body
LE: loop exit
PB: predicated region body
PF: predicated region fallthrough
CT: control target
= control target key end

     0   :  { %vm25_vm0 = vcmask 326656   ;;  %s192_s0 = inlined_call_operand.vmem [shape: f32[10,40], index: 0, kind: input, shape index: {}]   ;;  %s193_s1 = inlined_call_operand.vmem [shape: s32[10,1], index: 1, kind: input, shape index: {}]   ;;  %s194_s2 = inlined_call_operand.hbm [shape: f32[1,8,128], index: 2, kind: output, shape index: {}]  }
   0x1   :  { %v13_v0 = vld [vmem:[%s192_s0 + $0x8] sm:$0xff]  ;;  %v12_v1 = vld [vmem:[%s192_s0] sm:$0xff] }
   0x2   :  { %7 = vsyncpa [#allocation3], 0  ;;  %v15_v2 = vmul.f32 0.5, %v13_v0  ;;  %v14_v3 = vmul.f32 0.5, %v12_v1  ;;  %v68_v6 = vld [vmem:[%s193_s1 + $0x8] sm:$0xff]  ;;  %v152_v7 = vmov 0   ;;  %v16_v19 = vlaneseq }
   0x3   :  { %120 = vset.pattern.permute.xlu0 %v152_v7  ;;  %121 = vset.pattern.permute.xlu1 %v152_v7  ;;  %v67_v18 = vld [vmem:[%s193_s1] sm:$0xff]  ;;  %vm52_vm5 = vcmask 7168   ;;  %s153_s16 = smov [#allocation2]  }
   0x4   :  { %v29_v4 = vsel %vm25_vm0, %v15_v2, -inf  ;;  %v26_v5 = vsel %vm25_vm0, %v14_v3, -inf  ;;  %v17_v20 = vshrl.u32 %v16_v19, 7  ;;  %v66_v22 = vand.u32 127, %v16_v19  ;;  %s106_s17 = sshll.u32 %s153_s16, 4  ;;  %s107_s17 = int_to_ptr.vmem [resolvable:$true] %s106_s17 }
   0x5   :  { %30 = vmax.xlane.f32.xlu0 %v29_v4  ;;  %s130_s20 = scalar_lea.vmem %s107_s17, 128  ;;  %p135_p1 = scmp.lt.s32.totalorder %s107_s17, %s107_s17 }
   0x6   :  { %v18_v21 = vadd.s32 8, %v17_v20  ;;  %p131_p0 = scmp.ne.s32.totalorder %s107_s17, %s130_s20  ;;  %p136_p2 = scmp.lt.s32.totalorder %s130_s20, %s130_s20 }
   0x8   :  { %vm24_vm1 = vcmp.lt.s32.totalorder %v18_v21, 10  ;;  %p137_p3 = por %p136_p2, %p135_p1 }
   0x9   :  { %27 = vmax.xlane.f32.xlu0 %v26_v5 }
   0xa   :  { %p138_p4 = pnand %p137_p3, %p131_p0 }
  0x1f   :  { %73 = vperm.xlu0 %120, %v68_v6  }
  0x8e   :  { %v31_v8 = vpop.xlane.xlu0 %30 }
  0x8f   :  { %v33_v9 = vsub.f32 %v15_v2, %v31_v8 }
  0x91   :  { %v36_v10 = vmul.f32 1.442695, %v33_v9 }
  0x92   :  { %v28_v11 = vpop.xlane.xlu0 %27 }
  0x93   :  { %122 = vpow2.f32 %v36_v10  ;;  %v32_v12 = vsub.f32 %v14_v3, %v28_v11 }
  0x95   :  { %v34_v13 = vmul.f32 1.442695, %v32_v12 }
  0x97   :  { %124 = vpow2.f32 %v34_v13 }
  0x9a   :  { %v74_v23 = vpop.permute.xlu0 %73 }
  0x9b   :  { %vm76_vm2 = vcmp.eq.s32.totalorder %v66_v22, %v74_v23 }
  0x9c   :  { %vm82_vm3 = vmand %vm76_vm2, %vm24_vm1 }
  0x9d   :  { %v84_v26 = vsel %vm82_vm3, %v15_v2, 0.0 }
  0x9e   :  { %v86_v28 = vsel %vm25_vm0, %v84_v26, 0.0 }
  0xa0   :  { %v123_v14 = vpop.eup %122 }
  0xa1   :  { %v41_v15 = vsel %vm25_vm0, %v123_v14, 0.0 }
  0xa2   :  { %42 = vadd.xlane.f32.xlu1 %v41_v15 }
  0xa4   :  { %v125_v16 = vpop.eup %124 }
  0xa5   :  { %v38_v17 = vsel %vm25_vm0, %v125_v16, 0.0 }
  0xa6   :  { %39 = vadd.xlane.f32.xlu1 %v38_v17 }
  0xb7   :  { %70 = vperm.xlu1 %121, %v67_v18  }
 0x12b   :  { %v43_v24 = vpop.xlane.xlu1 %42 }
 0x12c   :  { %126 = vlog2.f32 %v43_v24 }
 0x12f   :  { %v40_v25 = vpop.xlane.xlu1 %39 }
 0x130   :  { %128 = vlog2.f32 %v40_v25 }
 0x133   :  { %v71_v27 = vpop.permute.xlu1 %70 }
 0x134   :  { %vm75_vm4 = vcmp.eq.s32.totalorder %v66_v22, %v71_v27 }
 0x135   :  { %v83_v29 = vsel %vm75_vm4, %v14_v3, 0.0 }
 0x136   :  { %v85_v30 = vsel %vm25_vm0, %v83_v29, 0.0 }
 0x137   :  { %v87_v31 = vadd.f32 %v86_v28, %v85_v30 }
 0x139   :  { %v127_v32 = vpop.eup %126  ;;  %88 = vadd.xlane.f32.xlu0 %v87_v31 }
 0x13a   :  { %v47_v33 = vmul.f32 0.6931472, %v127_v32 }
 0x13c   :  { %v49_v34 = vadd.f32 %v47_v33, %v31_v8 }
 0x13d   :  { %v129_v35 = vpop.eup %128 }
 0x13e   :  { %v45_v36 = vmul.f32 0.6931472, %v129_v35  ;;  %v51_v37 = vsel %vm24_vm1, %v49_v34, 0.0 }
 0x13f   :  { %v54_v40 = vsel %vm52_vm5, %v51_v37, 0.0 }
 0x140   :  { %v48_v38 = vadd.f32 %v45_v36, %v28_v11 }
 0x142   :  { %v53_v39 = vsel %vm52_vm5, %v48_v38, 0.0 }
 0x143   :  { %v55_v41 = vadd.f32 %v54_v40, %v53_v39 }
 0x145   :  { %56 = vadd.xlane.f32.xlu1 %v55_v41 }
 0x1c2   :  { %v89_v42 = vpop.xlane.xlu0 %88 }
 0x1c3   :  { %v90_v43 = vrot.slane %v89_v42, 4 }
 0x1c5   :  { %v91_v44 = vadd.f32 %v90_v43, %v89_v42 }
 0x1c7   :  { %v92_v45 = vrot.slane %v91_v44, 2 }
 0x1c9   :  { %v93_v49 = vadd.f32 %v92_v45, %v91_v44 }
 0x1cb   :  { %v94_v52 = vrot.slane %v93_v49, 1 }
 0x1cd   :  { %v95_v55 = vadd.f32 %v94_v52, %v93_v49 }
 0x1ce   :  { %v57_v46 = vpop.xlane.xlu1 %56 }
 0x1cf   :  { %v58_v47 = vrot.slane %v57_v46, 4 }
 0x1d1   :  { %v59_v48 = vadd.f32 %v58_v47, %v57_v46 }
 0x1d3   :  { %v60_v50 = vrot.slane %v59_v48, 2 }
 0x1d5   :  { %v61_v51 = vadd.f32 %v60_v50, %v59_v48 }
 0x1d7   :  { %v62_v53 = vrot.slane %v61_v51, 1 }
 0x1d9   :  { %v63_v54 = vadd.f32 %v62_v53, %v61_v51 }
 0x1db   :  { %114 = vpush %v63_v54 }
 0x1dc   :  { %116 = vpush %v95_v55 }
 0x20c   :  { %s115_s1 = spop %114 }
 0x20d   :  { %s117_s18 = spop %116 }
 0x20e   :  { %s97_s19 = ssub.f32 %s115_s1, %s117_s18 }
 0x210   :  { %v98_v56 = vstv %s97_s19 }
 0x211   :  { %99 = vst [vmem:[#allocation2] sm:$0xff] %v98_v56 }
 0x212   :  { %141 = shalt.err (!%p138_p4)
}
 0x213   :  { %109 = dma.vmem_to_hbm [thread:$0]  %s107_s17, 128, %s194_s2, [#allocation3]  }
 0x214   :  { %150 = dma.done.wait [#allocation3], 128  }
 0x215   :  { %151 = vsyncadd [#allocation3], 4294967168 }
 0x216   :  { %113 = vsyncpa [#allocation3], 1 }

</bundles_post_ra>
